<compile_context>
chip_gen: v5e
topology: v5e:2x2
jax: 0.10.0
libtpu: 0.0.40
codegen_flags: <defaults>
</compile_context>

<pallas_src>
import jax
import jax.numpy as jnp
from jax.experimental import pallas as pl
from jax.experimental.pallas import tpu as pltpu

EPS = 1e-5
LANES = 128
VMEM_LIMIT_BYTES = 32 * 1024 * 1024
VMEM_TILE_BUDGET = 8 * 1024 * 1024


def _pick_tile_rows(Ho, Wo, KC, Cout_pad, in_itemsize):
    """Largest divisor T of Ho whose per-grid-step working set fits the budget."""
    best = 1
    for T in range(1, Ho + 1):
        if Ho % T:
            continue
        in_bytes = 2 * 2 * (T + 1) * Wo * KC * in_itemsize   # 2 parity inputs, double-buffered
        slab_bytes = 3 * T * Wo * Cout_pad * 4               # acc scratch + out block buffers
        if in_bytes + slab_bytes <= VMEM_TILE_BUDGET:
            best = T
    return best


def conv_block_forward(x_nchw, weight_oihw, gamma, beta,
                       *, compute_dtype=jnp.bfloat16, tile_rows=None):
    """ConvBlock forward. x_nchw: (N, Cin, H, W); weight: (Cout, Cin, 3, 3)."""
    N, Cin, H, W = x_nchw.shape
    Cout = weight_oihw.shape[0]
    assert H % 2 == 0 and W % 2 == 0
    Ho, Wo = H // 2, W // 2
    KC = 4 * Cin                                    # folded contraction dim
    Cout_pad = ((Cout + LANES - 1) // LANES) * LANES

    in_itemsize = jnp.dtype(compute_dtype).itemsize
    T = tile_rows if tile_rows is not None else _pick_tile_rows(Ho, Wo, KC, Cout_pad, in_itemsize)
    assert Ho % T == 0
    NB = Ho // T                                    # row blocks
    R = (T + 1) * Wo                                # input rows per block (1 parity-row halo)
    MT = T * Wo                                     # output rows per block

    # ------------------------------------------------------------------ glue
    # NCHW -> NHWC, zero pad, then build two row-parity slabs with the 4
    # column offsets folded into channels:
    #   Xcol_p[n, u, j, rx*Cin + c] = xpad[n, 2u + p, 2j + rx, c]
    x = jnp.transpose(x_nchw, (0, 2, 3, 1))                      # (N, H, W, Cin)
    xpad = jnp.pad(x, ((0, 0), (1, 1), (1, 1), (0, 0)))          # (N, H+2, W+2, Cin)
    row_idx = jnp.arange(NB)[:, None] * T + jnp.arange(T + 1)[None, :]   # (NB, T+1)

    def build_parity(p):
        cols = [xpad[:, p::2, rx:rx + 2 * Wo:2, :] for rx in range(4)]   # (N, Ho+1, Wo, Cin) x4
        xc = jnp.concatenate(cols, axis=-1)                               # (N, Ho+1, Wo, KC)
        xb = xc[:, row_idx, :, :]                                         # (N, NB, T+1, Wo, KC)
        return xb.reshape(N, NB, R, KC).astype(compute_dtype)

    xe = build_parity(0)
    xo = build_parity(1)

    # Folded weights: Wfold[2a+bp, 2p+du][rx*Cin + c, o] = w[o, c, dy, dx]
    # with dy = 2*du + p - a, dx = rx - bp (zero if tap out of range).
    w_t = jnp.transpose(weight_oihw, (2, 3, 1, 0)).astype(jnp.float32)    # (3, 3, Cin, Cout)
    zero_blk = jnp.zeros((Cin, Cout), jnp.float32)
    phase_blocks = []
    for a in (0, 1):
        for bp in (0, 1):
            shift_blocks = []
            for p in (0, 1):
                for du in (0, 1):
                    dy = 2 * du + p - a
                    slots = []
                    for rx in range(4):
                        dx = rx - bp
                        if 0 <= dy <= 2 and 0 <= dx <= 2:
                            slots.append(w_t[dy, dx])
                        else:
                            slots.append(zero_blk)
                    shift_blocks.append(jnp.concatenate(slots, axis=0))    # (KC, Cout)
            phase_blocks.append(jnp.stack(shift_blocks, axis=0))           # (4, KC, Cout)
    wfold = jnp.stack(phase_blocks, axis=0)                                 # (4, 4, KC, Cout)
    wfold = jnp.pad(wfold, ((0, 0), (0, 0), (0, 0), (0, Cout_pad - Cout)))
    wfold = wfold.astype(compute_dtype)

    gamma_p = jnp.pad(gamma.astype(jnp.float32), (0, Cout_pad - Cout)).reshape(1, Cout_pad)
    beta_p = jnp.pad(beta.astype(jnp.float32), (0, Cout_pad - Cout)).reshape(1, Cout_pad)

    count = float(4 * N * Ho * Wo)       # = N*H*W conv elements per channel
    inv_count = 1.0 / count

    # ----------------------------------------------------------------- kernels
    def _accumulate_conv_phase(acc_ref, xe_ref, xo_ref, w_ref, a, bp):
        """acc_ref <- conv slab (MT, Cout_pad) f32 for pooling phase (a, bp)."""
        xpar = (xe_ref, xo_ref)
        first = True
        for du in (0, 1):
            for p in (0, 1):
                dy = 2 * du + p - a
                if not (0 <= dy <= 2):
                    continue                       # statically-skipped (all-zero weights)
                win = xpar[p][du * Wo: du * Wo + MT, :]            # (MT, KC)
                contrib = jnp.dot(win, w_ref[2 * a + bp, 2 * p + du],
                                  preferred_element_type=jnp.float32)
                if first:
                    acc_ref[...] = contrib
                    first = False
                else:
                    acc_ref[...] += contrib

    def stats_kernel(xe_ref, xo_ref, w_ref, sum_ref, sq_ref, acc_ref, s_acc, q_acc):
        n_i, b_i = pl.program_id(0), pl.program_id(1)

        @pl.when((n_i == 0) & (b_i == 0))
        def _init():
            s_acc[...] = jnp.zeros_like(s_acc)
            q_acc[...] = jnp.zeros_like(q_acc)

        s_tot = jnp.zeros((1, Cout_pad), jnp.float32)
        q_tot = jnp.zeros((1, Cout_pad), jnp.float32)
        for a in (0, 1):
            for bp in (0, 1):
                _accumulate_conv_phase(acc_ref, xe_ref, xo_ref, w_ref, a, bp)
                slab = acc_ref[...]
                s_tot = s_tot + jnp.sum(slab, axis=0, keepdims=True)
                q_tot = q_tot + jnp.sum(slab * slab, axis=0, keepdims=True)
        s_acc[...] += s_tot
        q_acc[...] += q_tot

        @pl.when((n_i == pl.num_programs(0) - 1) & (b_i == pl.num_programs(1) - 1))
        def _finalize():
            sum_ref[...] = s_acc[...]
            sq_ref[...] = q_acc[...]

    def normalize_pool_kernel(xe_ref, xo_ref, w_ref, sum_ref, sq_ref,
                              gamma_ref, beta_ref, out_ref, acc_ref):
        # BatchNorm2d training-mode batch stats (biased variance, eps=1e-5).
        # TODO(synk): for very large N*H*W switch the single-pass sum/sumsq
        # statistics to a shifted/compensated scheme to avoid cancellation.
        mean = sum_ref[...] * inv_count
        var = jnp.maximum(sq_ref[...] * inv_count - mean * mean, 0.0)
        inv_std = jax.lax.rsqrt(var + EPS)
        scale = gamma_ref[...] * inv_std                       # (1, Cout_pad)
        shift = beta_ref[...] - mean * scale

        first = True
        for a in (0, 1):
            for bp in (0, 1):
                _accumulate_conv_phase(acc_ref, xe_ref, xo_ref, w_ref, a, bp)
                y = jnp.maximum(acc_ref[...] * scale + shift, 0.0)   # BN + ReLU
                if first:
                    out_ref[...] = y.astype(out_ref.dtype)
                    first = False
                else:                                                 # 2x2 max pool
                    out_ref[...] = jnp.maximum(out_ref[...], y.astype(out_ref.dtype))

    # ------------------------------------------------------------- pallas_call
    grid = (N, NB)
    x_spec = pl.BlockSpec((None, None, R, KC), lambda n, b: (n, b, 0, 0))
    w_spec = pl.BlockSpec((4, 4, KC, Cout_pad), lambda n, b: (0, 0, 0, 0))
    vec_spec = pl.BlockSpec((1, Cout_pad), lambda n, b: (0, 0))

    sums, sumsq = pl.pallas_call(
        stats_kernel,
        grid_spec=pltpu.PrefetchScalarGridSpec(
            num_scalar_prefetch=0,
            grid=grid,
            in_specs=[x_spec, x_spec, w_spec],
            out_specs=[vec_spec, vec_spec],
            scratch_shapes=[pltpu.VMEM((MT, Cout_pad), jnp.float32),
                            pltpu.VMEM((1, Cout_pad), jnp.float32),
                            pltpu.VMEM((1, Cout_pad), jnp.float32)]),
        out_shape=(jax.ShapeDtypeStruct((1, Cout_pad), jnp.float32),
                   jax.ShapeDtypeStruct((1, Cout_pad), jnp.float32)),
        compiler_params=pltpu.CompilerParams(
            dimension_semantics=("arbitrary", "arbitrary"),
            vmem_limit_bytes=VMEM_LIMIT_BYTES),
    )(xe, xo, wfold)

    pooled = pl.pallas_call(
        normalize_pool_kernel,
        grid_spec=pltpu.PrefetchScalarGridSpec(
            num_scalar_prefetch=0,
            grid=grid,
            in_specs=[x_spec, x_spec, w_spec, vec_spec, vec_spec, vec_spec, vec_spec],
            out_specs=pl.BlockSpec((None, None, MT, Cout_pad), lambda n, b: (n, b, 0, 0)),
            scratch_shapes=[pltpu.VMEM((MT, Cout_pad), jnp.float32)]),
        out_shape=jax.ShapeDtypeStruct((N, NB, MT, Cout_pad), jnp.float32),
        compiler_params=pltpu.CompilerParams(
            dimension_semantics=("parallel", "parallel"),
            vmem_limit_bytes=VMEM_LIMIT_BYTES),
    )(xe, xo, wfold, sums, sumsq, gamma_p, beta_p)

    # Strip channel padding, back to PyTorch NCHW convention.
    out = pooled[..., :Cout].reshape(N, Ho, Wo, Cout)
    return jnp.transpose(out, (0, 3, 1, 2))                    # (N, Cout, Ho, Wo)


def reference_forward(x_nchw, weight_oihw, gamma, beta):
    """Pure-JAX reference mirroring the PyTorch ConvBlock (training-mode BN)."""
    conv = jax.lax.conv_general_dilated(
        x_nchw, weight_oihw, window_strides=(1, 1),
        padding=((1, 1), (1, 1)),
        dimension_numbers=("NCHW", "OIHW", "NCHW"))
    mean = jnp.mean(conv, axis=(0, 2, 3), keepdims=True)
    var = jnp.mean((conv - mean) ** 2, axis=(0, 2, 3), keepdims=True)
    y = (conv - mean) / jnp.sqrt(var + EPS)
    y = y * gamma.reshape(1, -1, 1, 1) + beta.reshape(1, -1, 1, 1)
    y = jnp.maximum(y, 0.0)
    return jax.lax.reduce_window(y, -jnp.inf, jax.lax.max,
                                 (1, 1, 2, 2), (1, 1, 2, 2), "VALID")


if __name__ == "__main__":
    key = jax.random.PRNGKey(0)
    k_x, k_w, k_g, k_b = jax.random.split(key, 4)

    N, Cin, Cout, H, W = 2, 4, 8, 16, 16
    x = jax.random.normal(k_x, (N, Cin, H, W), dtype=jnp.float32)
    weight = 0.1 * jax.random.normal(k_w, (Cout, Cin, 3, 3), dtype=jnp.float32)
    gamma = 1.0 + 0.1 * jax.random.normal(k_g, (Cout,), dtype=jnp.float32)
    beta = 0.1 * jax.random.normal(k_b, (Cout,), dtype=jnp.float32)

    ref = jax.block_until_ready(reference_forward(x, weight, gamma, beta))

    # f32 MXU operand path: tight check.
    out_f32 = jax.block_until_ready(
        conv_block_forward(x, weight, gamma, beta, compute_dtype=jnp.float32))
    assert out_f32.shape == (N, Cout, H // 2, W // 2), out_f32.shape
    err_f32 = float(jnp.max(jnp.abs(out_f32 - ref)))
    assert jnp.allclose(out_f32, ref, rtol=1e-4, atol=1e-4), f"f32 max err {err_f32:.3e}"

    # bf16 MXU operand path (v6e/v7x fast path, f32 accumulation): loose check.
    out_bf16 = jax.block_until_ready(
        conv_block_forward(x, weight, gamma, beta, compute_dtype=jnp.bfloat16))
    assert out_bf16.shape == (N, Cout, H // 2, W // 2), out_bf16.shape
    err_bf16 = float(jnp.max(jnp.abs(out_bf16 - ref)))
    assert jnp.allclose(out_bf16, ref, rtol=5e-2, atol=5e-2), f"bf16 max err {err_bf16:.3e}"

    print("KERNEL_OK")
</pallas_src>

<mosaic_0001>
module attributes {stable_mosaic.version = 11 : i64} {
  func.func @stats_kernel(%arg0: i32, %arg1: i32, %arg2: memref<1x1x72x16xf32, #tpu.memory_space<vmem>>, %arg3: memref<1x1x72x16xf32, #tpu.memory_space<vmem>>, %arg4: memref<4x4x16x128xf32, #tpu.memory_space<vmem>>, %arg5: memref<1x128xf32, #tpu.memory_space<vmem>>, %arg6: memref<1x128xf32, #tpu.memory_space<vmem>>, %arg7: memref<64x128xf32, #tpu.memory_space<vmem>>, %arg8: memref<1x128xf32, #tpu.memory_space<vmem>>, %arg9: memref<1x128xf32, #tpu.memory_space<vmem>>) attributes {dimension_semantics = [#tpu.dimension_semantics<arbitrary>, #tpu.dimension_semantics<arbitrary>], iteration_bounds = array<i64: 2, 1>, scalar_prefetch = 0 : i64, scratch_operands = 3 : i64, tpu.core_type = #tpu.core_type<tc>, window_params = [{transform_indices = @transform_0, window_bounds = array<i64: 1, 1, 72, 16>}, {transform_indices = @transform_1, window_bounds = array<i64: 1, 1, 72, 16>}, {pipeline_mode = #tpu.pipeline_mode<synchronous>, transform_indices = @transform_2, window_bounds = array<i64: 4, 4, 16, 128>}, {pipeline_mode = #tpu.pipeline_mode<synchronous>, transform_indices = @transform_3, window_bounds = array<i64: 1, 128>}, {pipeline_mode = #tpu.pipeline_mode<synchronous>, transform_indices = @transform_4, window_bounds = array<i64: 1, 128>}]} {
    %c0_i32 = arith.constant 0 : i32
    %0 = arith.cmpi eq, %arg0, %c0_i32 : i32
    %c0_i32_0 = arith.constant 0 : i32
    %1 = arith.cmpi eq, %arg1, %c0_i32_0 : i32
    %2 = arith.andi %0, %1 : i1
    %3 = arith.extui %2 : i1 to i32
    %c0_i32_1 = arith.constant 0 : i32
    %4 = arith.cmpi ne, %3, %c0_i32_1 : i32
    scf.if %4 {
      %cst_172 = arith.constant 0.000000e+00 : f32
      %138 = vector.broadcast %cst_172 : f32 to vector<1x128xf32>
      %c0_173 = arith.constant 0 : index
      %c0_174 = arith.constant 0 : index
      %139 = vector.load %arg8[%c0_173, %c0_174] : memref<1x128xf32, #tpu.memory_space<vmem>>, vector<1x128xf32>
      tpu.vector_store %arg8[%c0_173, %c0_174], %138 {strides = array<i32>} : memref<1x128xf32, #tpu.memory_space<vmem>>, vector<1x128xf32>,
      %cst_175 = arith.constant 0.000000e+00 : f32
      %140 = vector.broadcast %cst_175 : f32 to vector<1x128xf32>
      %c0_176 = arith.constant 0 : index
      %c0_177 = arith.constant 0 : index
      %141 = vector.load %arg9[%c0_176, %c0_177] : memref<1x128xf32, #tpu.memory_space<vmem>>, vector<1x128xf32>
      tpu.vector_store %arg9[%c0_176, %c0_177], %140 {strides = array<i32>} : memref<1x128xf32, #tpu.memory_space<vmem>>, vector<1x128xf32>,
    } else {
    }
    %cst = arith.constant 0.000000e+00 : f32
    %5 = vector.broadcast %cst : f32 to vector<1x128xf32>
    %cst_2 = arith.constant 0.000000e+00 : f32
    %6 = vector.broadcast %cst_2 : f32 to vector<1x128xf32>
    %c0 = arith.constant 0 : index
    %c0_3 = arith.constant 0 : index
    %c0_4 = arith.constant 0 : index
    %c0_5 = arith.constant 0 : index
    %7 = vector.load %arg2[%c0, %c0_3, %c0_4, %c0_5] : memref<1x1x72x16xf32, #tpu.memory_space<vmem>>, vector<1x1x64x16xf32>
    %8 = vector.shape_cast %7 : vector<1x1x64x16xf32> to vector<64x16xf32>
    %c0_6 = arith.constant 0 : index
    %c0_7 = arith.constant 0 : index
    %c0_8 = arith.constant 0 : index
    %c0_9 = arith.constant 0 : index
    %9 = vector.load %arg4[%c0_6, %c0_7, %c0_8, %c0_9] : memref<4x4x16x128xf32, #tpu.memory_space<vmem>>, vector<1x1x16x128xf32>
    %10 = vector.shape_cast %9 : vector<1x1x16x128xf32> to vector<16x128xf32>
    %cst_10 = arith.constant dense<0.000000e+00> : vector<64x128xf32>
    %11 = tpu.matmul %8, %10, %cst_10 {dimension_numbers = #tpu.dot_dimension_numbers<[1], [0], [0], [1], [0, 0, 1, 1], [], []>} : vector<64x16xf32>, vector<16x128xf32>, vector<64x128xf32> -> vector<64x128xf32>
    %c0_11 = arith.constant 0 : index
    %c0_12 = arith.constant 0 : index
    %12 = vector.load %arg7[%c0_11, %c0_12] : memref<64x128xf32, #tpu.memory_space<vmem>>, vector<64x128xf32>
    tpu.vector_store %arg7[%c0_11, %c0_12], %11 {strides = array<i32>} : memref<64x128xf32, #tpu.memory_space<vmem>>, vector<64x128xf32>,
    %c0_13 = arith.constant 0 : index
    %c0_14 = arith.constant 0 : index
    %c0_15 = arith.constant 0 : index
    %c0_16 = arith.constant 0 : index
    %13 = vector.load %arg3[%c0_13, %c0_14, %c0_15, %c0_16] : memref<1x1x72x16xf32, #tpu.memory_space<vmem>>, vector<1x1x64x16xf32>
    %14 = vector.shape_cast %13 : vector<1x1x64x16xf32> to vector<64x16xf32>
    %c0_17 = arith.constant 0 : index
    %c2 = arith.constant 2 : index
    %c0_18 = arith.constant 0 : index
    %c0_19 = arith.constant 0 : index
    %15 = vector.load %arg4[%c0_17, %c2, %c0_18, %c0_19] : memref<4x4x16x128xf32, #tpu.memory_space<vmem>>, vector<1x1x16x128xf32>
    %16 = vector.shape_cast %15 : vector<1x1x16x128xf32> to vector<16x128xf32>
    %cst_20 = arith.constant dense<0.000000e+00> : vector<64x128xf32>
    %17 = tpu.matmul %14, %16, %cst_20 {dimension_numbers = #tpu.dot_dimension_numbers<[1], [0], [0], [1], [0, 0, 1, 1], [], []>} : vector<64x16xf32>, vector<16x128xf32>, vector<64x128xf32> -> vector<64x128xf32>
    %c0_21 = arith.constant 0 : index
    %c0_22 = arith.constant 0 : index
    %18 = vector.load %arg7[%c0_21, %c0_22] : memref<64x128xf32, #tpu.memory_space<vmem>>, vector<64x128xf32>
    %19 = arith.addf %18, %17 : vector<64x128xf32>
    %c0_23 = arith.constant 0 : index
    %c0_24 = arith.constant 0 : index
    %20 = vector.load %arg7[%c0_23, %c0_24] : memref<64x128xf32, #tpu.memory_space<vmem>>, vector<64x128xf32>
    tpu.vector_store %arg7[%c0_23, %c0_24], %19 {strides = array<i32>} : memref<64x128xf32, #tpu.memory_space<vmem>>, vector<64x128xf32>,
    %c0_25 = arith.constant 0 : index
    %c0_26 = arith.constant 0 : index
    %c8 = arith.constant 8 : index
    %c0_27 = arith.constant 0 : index
    %21 = vector.load %arg2[%c0_25, %c0_26, %c8, %c0_27] : memref<1x1x72x16xf32, #tpu.memory_space<vmem>>, vector<1x1x64x16xf32>
    %22 = vector.shape_cast %21 : vector<1x1x64x16xf32> to vector<64x16xf32>
    %c0_28 = arith.constant 0 : index
    %c1 = arith.constant 1 : index
    %c0_29 = arith.constant 0 : index
    %c0_30 = arith.constant 0 : index
    %23 = vector.load %arg4[%c0_28, %c1, %c0_29, %c0_30] : memref<4x4x16x128xf32, #tpu.memory_space<vmem>>, vector<1x1x16x128xf32>
    %24 = vector.shape_cast %23 : vector<1x1x16x128xf32> to vector<16x128xf32>
    %cst_31 = arith.constant dense<0.000000e+00> : vector<64x128xf32>
    %25 = tpu.matmul %22, %24, %cst_31 {dimension_numbers = #tpu.dot_dimension_numbers<[1], [0], [0], [1], [0, 0, 1, 1], [], []>} : vector<64x16xf32>, vector<16x128xf32>, vector<64x128xf32> -> vector<64x128xf32>
    %c0_32 = arith.constant 0 : index
    %c0_33 = arith.constant 0 : index
    %26 = vector.load %arg7[%c0_32, %c0_33] : memref<64x128xf32, #tpu.memory_space<vmem>>, vector<64x128xf32>
    %27 = arith.addf %26, %25 : vector<64x128xf32>
    %c0_34 = arith.constant 0 : index
    %c0_35 = arith.constant 0 : index
    %28 = vector.load %arg7[%c0_34, %c0_35] : memref<64x128xf32, #tpu.memory_space<vmem>>, vector<64x128xf32>
    tpu.vector_store %arg7[%c0_34, %c0_35], %27 {strides = array<i32>} : memref<64x128xf32, #tpu.memory_space<vmem>>, vector<64x128xf32>,
    %c0_36 = arith.constant 0 : index
    %c0_37 = arith.constant 0 : index
    %29 = vector.load %arg7[%c0_36, %c0_37] : memref<64x128xf32, #tpu.memory_space<vmem>>, vector<64x128xf32>
    %cst_38 = arith.constant dense<0.000000e+00> : vector<128xf32>
    %30 = vector.multi_reduction <add>, %29, %cst_38 [0] : vector<64x128xf32> to vector<128xf32>
    %31 = vector.shape_cast %30 : vector<128xf32> to vector<1x128xf32>
    %32 = arith.addf %5, %31 : vector<1x128xf32>
    %33 = arith.mulf %29, %29 : vector<64x128xf32>
    %cst_39 = arith.constant dense<0.000000e+00> : vector<128xf32>
    %34 = vector.multi_reduction <add>, %33, %cst_39 [0] : vector<64x128xf32> to vector<128xf32>
    %35 = vector.shape_cast %34 : vector<128xf32> to vector<1x128xf32>
    %36 = arith.addf %6, %35 : vector<1x128xf32>
    %c0_40 = arith.constant 0 : index
    %c0_41 = arith.constant 0 : index
    %c0_42 = arith.constant 0 : index
    %c0_43 = arith.constant 0 : index
    %37 = vector.load %arg2[%c0_40, %c0_41, %c0_42, %c0_43] : memref<1x1x72x16xf32, #tpu.memory_space<vmem>>, vector<1x1x64x16xf32>
    %38 = vector.shape_cast %37 : vector<1x1x64x16xf32> to vector<64x16xf32>
    %c1_44 = arith.constant 1 : index
    %c0_45 = arith.constant 0 : index
    %c0_46 = arith.constant 0 : index
    %c0_47 = arith.constant 0 : index
    %39 = vector.load %arg4[%c1_44, %c0_45, %c0_46, %c0_47] : memref<4x4x16x128xf32, #tpu.memory_space<vmem>>, vector<1x1x16x128xf32>
    %40 = vector.shape_cast %39 : vector<1x1x16x128xf32> to vector<16x128xf32>
    %cst_48 = arith.constant dense<0.000000e+00> : vector<64x128xf32>
    %41 = tpu.matmul %38, %40, %cst_48 {dimension_numbers = #tpu.dot_dimension_numbers<[1], [0], [0], [1], [0, 0, 1, 1], [], []>} : vector<64x16xf32>, vector<16x128xf32>, vector<64x128xf32> -> vector<64x128xf32>
    %c0_49 = arith.constant 0 : index
    %c0_50 = arith.constant 0 : index
    %42 = vector.load %arg7[%c0_49, %c0_50] : memref<64x128xf32, #tpu.memory_space<vmem>>, vector<64x128xf32>
    tpu.vector_store %arg7[%c0_49, %c0_50], %41 {strides = array<i32>} : memref<64x128xf32, #tpu.memory_space<vmem>>, vector<64x128xf32>,
    %c0_51 = arith.constant 0 : index
    %c0_52 = arith.constant 0 : index
    %c0_53 = arith.constant 0 : index
    %c0_54 = arith.constant 0 : index
    %43 = vector.load %arg3[%c0_51, %c0_52, %c0_53, %c0_54] : memref<1x1x72x16xf32, #tpu.memory_space<vmem>>, vector<1x1x64x16xf32>
    %44 = vector.shape_cast %43 : vector<1x1x64x16xf32> to vector<64x16xf32>
    %c1_55 = arith.constant 1 : index
    %c2_56 = arith.constant 2 : index
    %c0_57 = arith.constant 0 : index
    %c0_58 = arith.constant 0 : index
    %45 = vector.load %arg4[%c1_55, %c2_56, %c0_57, %c0_58] : memref<4x4x16x128xf32, #tpu.memory_space<vmem>>, vector<1x1x16x128xf32>
    %46 = vector.shape_cast %45 : vector<1x1x16x128xf32> to vector<16x128xf32>
    %cst_59 = arith.constant dense<0.000000e+00> : vector<64x128xf32>
    %47 = tpu.matmul %44, %46, %cst_59 {dimension_numbers = #tpu.dot_dimension_numbers<[1], [0], [0], [1], [0, 0, 1, 1], [], []>} : vector<64x16xf32>, vector<16x128xf32>, vector<64x128xf32> -> vector<64x128xf32>
    %c0_60 = arith.constant 0 : index
    %c0_61 = arith.constant 0 : index
    %48 = vector.load %arg7[%c0_60, %c0_61] : memref<64x128xf32, #tpu.memory_space<vmem>>, vector<64x128xf32>
    %49 = arith.addf %48, %47 : vector<64x128xf32>
    %c0_62 = arith.constant 0 : index
    %c0_63 = arith.constant 0 : index
    %50 = vector.load %arg7[%c0_62, %c0_63] : memref<64x128xf32, #tpu.memory_space<vmem>>, vector<64x128xf32>
    tpu.vector_store %arg7[%c0_62, %c0_63], %49 {strides = array<i32>} : memref<64x128xf32, #tpu.memory_space<vmem>>, vector<64x128xf32>,
    %c0_64 = arith.constant 0 : index
    %c0_65 = arith.constant 0 : index
    %c8_66 = arith.constant 8 : index
    %c0_67 = arith.constant 0 : index
    %51 = vector.load %arg2[%c0_64, %c0_65, %c8_66, %c0_67] : memref<1x1x72x16xf32, #tpu.memory_space<vmem>>, vector<1x1x64x16xf32>
    %52 = vector.shape_cast %51 : vector<1x1x64x16xf32> to vector<64x16xf32>
    %c1_68 = arith.constant 1 : index
    %c1_69 = arith.constant 1 : index
    %c0_70 = arith.constant 0 : index
    %c0_71 = arith.constant 0 : index
    %53 = vector.load %arg4[%c1_68, %c1_69, %c0_70, %c0_71] : memref<4x4x16x128xf32, #tpu.memory_space<vmem>>, vector<1x1x16x128xf32>
    %54 = vector.shape_cast %53 : vector<1x1x16x128xf32> to vector<16x128xf32>
    %cst_72 = arith.constant dense<0.000000e+00> : vector<64x128xf32>
    %55 = tpu.matmul %52, %54, %cst_72 {dimension_numbers = #tpu.dot_dimension_numbers<[1], [0], [0], [1], [0, 0, 1, 1], [], []>} : vector<64x16xf32>, vector<16x128xf32>, vector<64x128xf32> -> vector<64x128xf32>
    %c0_73 = arith.constant 0 : index
    %c0_74 = arith.constant 0 : index
    %56 = vector.load %arg7[%c0_73, %c0_74] : memref<64x128xf32, #tpu.memory_space<vmem>>, vector<64x128xf32>
    %57 = arith.addf %56, %55 : vector<64x128xf32>
    %c0_75 = arith.constant 0 : index
    %c0_76 = arith.constant 0 : index
    %58 = vector.load %arg7[%c0_75, %c0_76] : memref<64x128xf32, #tpu.memory_space<vmem>>, vector<64x128xf32>
    tpu.vector_store %arg7[%c0_75, %c0_76], %57 {strides = array<i32>} : memref<64x128xf32, #tpu.memory_space<vmem>>, vector<64x128xf32>,
    %c0_77 = arith.constant 0 : index
    %c0_78 = arith.constant 0 : index
    %59 = vector.load %arg7[%c0_77, %c0_78] : memref<64x128xf32, #tpu.memory_space<vmem>>, vector<64x128xf32>
    %cst_79 = arith.constant dense<0.000000e+00> : vector<128xf32>
    %60 = vector.multi_reduction <add>, %59, %cst_79 [0] : vector<64x128xf32> to vector<128xf32>
    %61 = vector.shape_cast %60 : vector<128xf32> to vector<1x128xf32>
    %62 = arith.addf %32, %61 : vector<1x128xf32>
    %63 = arith.mulf %59, %59 : vector<64x128xf32>
    %cst_80 = arith.constant dense<0.000000e+00> : vector<128xf32>
    %64 = vector.multi_reduction <add>, %63, %cst_80 [0] : vector<64x128xf32> to vector<128xf32>
    %65 = vector.shape_cast %64 : vector<128xf32> to vector<1x128xf32>
    %66 = arith.addf %36, %65 : vector<1x128xf32>
    %c0_81 = arith.constant 0 : index
    %c0_82 = arith.constant 0 : index
    %c0_83 = arith.constant 0 : index
    %c0_84 = arith.constant 0 : index
    %67 = vector.load %arg3[%c0_81, %c0_82, %c0_83, %c0_84] : memref<1x1x72x16xf32, #tpu.memory_space<vmem>>, vector<1x1x64x16xf32>
    %68 = vector.shape_cast %67 : vector<1x1x64x16xf32> to vector<64x16xf32>
    %c2_85 = arith.constant 2 : index
    %c2_86 = arith.constant 2 : index
    %c0_87 = arith.constant 0 : index
    %c0_88 = arith.constant 0 : index
    %69 = vector.load %arg4[%c2_85, %c2_86, %c0_87, %c0_88] : memref<4x4x16x128xf32, #tpu.memory_space<vmem>>, vector<1x1x16x128xf32>
    %70 = vector.shape_cast %69 : vector<1x1x16x128xf32> to vector<16x128xf32>
    %cst_89 = arith.constant dense<0.000000e+00> : vector<64x128xf32>
    %71 = tpu.matmul %68, %70, %cst_89 {dimension_numbers = #tpu.dot_dimension_numbers<[1], [0], [0], [1], [0, 0, 1, 1], [], []>} : vector<64x16xf32>, vector<16x128xf32>, vector<64x128xf32> -> vector<64x128xf32>
    %c0_90 = arith.constant 0 : index
    %c0_91 = arith.constant 0 : index
    %72 = vector.load %arg7[%c0_90, %c0_91] : memref<64x128xf32, #tpu.memory_space<vmem>>, vector<64x128xf32>
    tpu.vector_store %arg7[%c0_90, %c0_91], %71 {strides = array<i32>} : memref<64x128xf32, #tpu.memory_space<vmem>>, vector<64x128xf32>,
    %c0_92 = arith.constant 0 : index
    %c0_93 = arith.constant 0 : index
    %c8_94 = arith.constant 8 : index
    %c0_95 = arith.constant 0 : index
    %73 = vector.load %arg2[%c0_92, %c0_93, %c8_94, %c0_95] : memref<1x1x72x16xf32, #tpu.memory_space<vmem>>, vector<1x1x64x16xf32>
    %74 = vector.shape_cast %73 : vector<1x1x64x16xf32> to vector<64x16xf32>
    %c2_96 = arith.constant 2 : index
    %c1_97 = arith.constant 1 : index
    %c0_98 = arith.constant 0 : index
    %c0_99 = arith.constant 0 : index
    %75 = vector.load %arg4[%c2_96, %c1_97, %c0_98, %c0_99] : memref<4x4x16x128xf32, #tpu.memory_space<vmem>>, vector<1x1x16x128xf32>
    %76 = vector.shape_cast %75 : vector<1x1x16x128xf32> to vector<16x128xf32>
    %cst_100 = arith.constant dense<0.000000e+00> : vector<64x128xf32>
    %77 = tpu.matmul %74, %76, %cst_100 {dimension_numbers = #tpu.dot_dimension_numbers<[1], [0], [0], [1], [0, 0, 1, 1], [], []>} : vector<64x16xf32>, vector<16x128xf32>, vector<64x128xf32> -> vector<64x128xf32>
    %c0_101 = arith.constant 0 : index
    %c0_102 = arith.constant 0 : index
    %78 = vector.load %arg7[%c0_101, %c0_102] : memref<64x128xf32, #tpu.memory_space<vmem>>, vector<64x128xf32>
    %79 = arith.addf %78, %77 : vector<64x128xf32>
    %c0_103 = arith.constant 0 : index
    %c0_104 = arith.constant 0 : index
    %80 = vector.load %arg7[%c0_103, %c0_104] : memref<64x128xf32, #tpu.memory_space<vmem>>, vector<64x128xf32>
    tpu.vector_store %arg7[%c0_103, %c0_104], %79 {strides = array<i32>} : memref<64x128xf32, #tpu.memory_space<vmem>>, vector<64x128xf32>,
    %c0_105 = arith.constant 0 : index
    %c0_106 = arith.constant 0 : index
    %c8_107 = arith.constant 8 : index
    %c0_108 = arith.constant 0 : index
    %81 = vector.load %arg3[%c0_105, %c0_106, %c8_107, %c0_108] : memref<1x1x72x16xf32, #tpu.memory_space<vmem>>, vector<1x1x64x16xf32>
    %82 = vector.shape_cast %81 : vector<1x1x64x16xf32> to vector<64x16xf32>
    %c2_109 = arith.constant 2 : index
    %c3 = arith.constant 3 : index
    %c0_110 = arith.constant 0 : index
    %c0_111 = arith.constant 0 : index
    %83 = vector.load %arg4[%c2_109, %c3, %c0_110, %c0_111] : memref<4x4x16x128xf32, #tpu.memory_space<vmem>>, vector<1x1x16x128xf32>
    %84 = vector.shape_cast %83 : vector<1x1x16x128xf32> to vector<16x128xf32>
    %cst_112 = arith.constant dense<0.000000e+00> : vector<64x128xf32>
    %85 = tpu.matmul %82, %84, %cst_112 {dimension_numbers = #tpu.dot_dimension_numbers<[1], [0], [0], [1], [0, 0, 1, 1], [], []>} : vector<64x16xf32>, vector<16x128xf32>, vector<64x128xf32> -> vector<64x128xf32>
    %c0_113 = arith.constant 0 : index
    %c0_114 = arith.constant 0 : index
    %86 = vector.load %arg7[%c0_113, %c0_114] : memref<64x128xf32, #tpu.memory_space<vmem>>, vector<64x128xf32>
    %87 = arith.addf %86, %85 : vector<64x128xf32>
    %c0_115 = arith.constant 0 : index
    %c0_116 = arith.constant 0 : index
    %88 = vector.load %arg7[%c0_115, %c0_116] : memref<64x128xf32, #tpu.memory_space<vmem>>, vector<64x128xf32>
    tpu.vector_store %arg7[%c0_115, %c0_116], %87 {strides = array<i32>} : memref<64x128xf32, #tpu.memory_space<vmem>>, vector<64x128xf32>,
    %c0_117 = arith.constant 0 : index
    %c0_118 = arith.constant 0 : index
    %89 = vector.load %arg7[%c0_117, %c0_118] : memref<64x128xf32, #tpu.memory_space<vmem>>, vector<64x128xf32>
    %cst_119 = arith.constant dense<0.000000e+00> : vector<128xf32>
    %90 = vector.multi_reduction <add>, %89, %cst_119 [0] : vector<64x128xf32> to vector<128xf32>
    %91 = vector.shape_cast %90 : vector<128xf32> to vector<1x128xf32>
    %92 = arith.addf %62, %91 : vector<1x128xf32>
    %93 = arith.mulf %89, %89 : vector<64x128xf32>
    %cst_120 = arith.constant dense<0.000000e+00> : vector<128xf32>
    %94 = vector.multi_reduction <add>, %93, %cst_120 [0] : vector<64x128xf32> to vector<128xf32>
    %95 = vector.shape_cast %94 : vector<128xf32> to vector<1x128xf32>
    %96 = arith.addf %66, %95 : vector<1x128xf32>
    %c0_121 = arith.constant 0 : index
    %c0_122 = arith.constant 0 : index
    %c0_123 = arith.constant 0 : index
    %c0_124 = arith.constant 0 : index
    %97 = vector.load %arg3[%c0_121, %c0_122, %c0_123, %c0_124] : memref<1x1x72x16xf32, #tpu.memory_space<vmem>>, vector<1x1x64x16xf32>
    %98 = vector.shape_cast %97 : vector<1x1x64x16xf32> to vector<64x16xf32>
    %c3_125 = arith.constant 3 : index
    %c2_126 = arith.constant 2 : index
    %c0_127 = arith.constant 0 : index
    %c0_128 = arith.constant 0 : index
    %99 = vector.load %arg4[%c3_125, %c2_126, %c0_127, %c0_128] : memref<4x4x16x128xf32, #tpu.memory_space<vmem>>, vector<1x1x16x128xf32>
    %100 = vector.shape_cast %99 : vector<1x1x16x128xf32> to vector<16x128xf32>
    %cst_129 = arith.constant dense<0.000000e+00> : vector<64x128xf32>
    %101 = tpu.matmul %98, %100, %cst_129 {dimension_numbers = #tpu.dot_dimension_numbers<[1], [0], [0], [1], [0, 0, 1, 1], [], []>} : vector<64x16xf32>, vector<16x128xf32>, vector<64x128xf32> -> vector<64x128xf32>
    %c0_130 = arith.constant 0 : index
    %c0_131 = arith.constant 0 : index
    %102 = vector.load %arg7[%c0_130, %c0_131] : memref<64x128xf32, #tpu.memory_space<vmem>>, vector<64x128xf32>
    tpu.vector_store %arg7[%c0_130, %c0_131], %101 {strides = array<i32>} : memref<64x128xf32, #tpu.memory_space<vmem>>, vector<64x128xf32>,
    %c0_132 = arith.constant 0 : index
    %c0_133 = arith.constant 0 : index
    %c8_134 = arith.constant 8 : index
    %c0_135 = arith.constant 0 : index
    %103 = vector.load %arg2[%c0_132, %c0_133, %c8_134, %c0_135] : memref<1x1x72x16xf32, #tpu.memory_space<vmem>>, vector<1x1x64x16xf32>
    %104 = vector.shape_cast %103 : vector<1x1x64x16xf32> to vector<64x16xf32>
    %c3_136 = arith.constant 3 : index
    %c1_137 = arith.constant 1 : index
    %c0_138 = arith.constant 0 : index
    %c0_139 = arith.constant 0 : index
    %105 = vector.load %arg4[%c3_136, %c1_137, %c0_138, %c0_139] : memref<4x4x16x128xf32, #tpu.memory_space<vmem>>, vector<1x1x16x128xf32>
    %106 = vector.shape_cast %105 : vector<1x1x16x128xf32> to vector<16x128xf32>
    %cst_140 = arith.constant dense<0.000000e+00> : vector<64x128xf32>
    %107 = tpu.matmul %104, %106, %cst_140 {dimension_numbers = #tpu.dot_dimension_numbers<[1], [0], [0], [1], [0, 0, 1, 1], [], []>} : vector<64x16xf32>, vector<16x128xf32>, vector<64x128xf32> -> vector<64x128xf32>
    %c0_141 = arith.constant 0 : index
    %c0_142 = arith.constant 0 : index
    %108 = vector.load %arg7[%c0_141, %c0_142] : memref<64x128xf32, #tpu.memory_space<vmem>>, vector<64x128xf32>
    %109 = arith.addf %108, %107 : vector<64x128xf32>
    %c0_143 = arith.constant 0 : index
    %c0_144 = arith.constant 0 : index
    %110 = vector.load %arg7[%c0_143, %c0_144] : memref<64x128xf32, #tpu.memory_space<vmem>>, vector<64x128xf32>
    tpu.vector_store %arg7[%c0_143, %c0_144], %109 {strides = array<i32>} : memref<64x128xf32, #tpu.memory_space<vmem>>, vector<64x128xf32>,
    %c0_145 = arith.constant 0 : index
    %c0_146 = arith.constant 0 : index
    %c8_147 = arith.constant 8 : index
    %c0_148 = arith.constant 0 : index
    %111 = vector.load %arg3[%c0_145, %c0_146, %c8_147, %c0_148] : memref<1x1x72x16xf32, #tpu.memory_space<vmem>>, vector<1x1x64x16xf32>
    %112 = vector.shape_cast %111 : vector<1x1x64x16xf32> to vector<64x16xf32>
    %c3_149 = arith.constant 3 : index
    %c3_150 = arith.constant 3 : index
    %c0_151 = arith.constant 0 : index
    %c0_152 = arith.constant 0 : index
    %113 = vector.load %arg4[%c3_149, %c3_150, %c0_151, %c0_152] : memref<4x4x16x128xf32, #tpu.memory_space<vmem>>, vector<1x1x16x128xf32>
    %114 = vector.shape_cast %113 : vector<1x1x16x128xf32> to vector<16x128xf32>
    %cst_153 = arith.constant dense<0.000000e+00> : vector<64x128xf32>
    %115 = tpu.matmul %112, %114, %cst_153 {dimension_numbers = #tpu.dot_dimension_numbers<[1], [0], [0], [1], [0, 0, 1, 1], [], []>} : vector<64x16xf32>, vector<16x128xf32>, vector<64x128xf32> -> vector<64x128xf32>
    %c0_154 = arith.constant 0 : index
    %c0_155 = arith.constant 0 : index
    %116 = vector.load %arg7[%c0_154, %c0_155] : memref<64x128xf32, #tpu.memory_space<vmem>>, vector<64x128xf32>
    %117 = arith.addf %116, %115 : vector<64x128xf32>
    %c0_156 = arith.constant 0 : index
    %c0_157 = arith.constant 0 : index
    %118 = vector.load %arg7[%c0_156, %c0_157] : memref<64x128xf32, #tpu.memory_space<vmem>>, vector<64x128xf32>
    tpu.vector_store %arg7[%c0_156, %c0_157], %117 {strides = array<i32>} : memref<64x128xf32, #tpu.memory_space<vmem>>, vector<64x128xf32>,
    %c0_158 = arith.constant 0 : index
    %c0_159 = arith.constant 0 : index
    %119 = vector.load %arg7[%c0_158, %c0_159] : memref<64x128xf32, #tpu.memory_space<vmem>>, vector<64x128xf32>
    %cst_160 = arith.constant dense<0.000000e+00> : vector<128xf32>
    %120 = vector.multi_reduction <add>, %119, %cst_160 [0] : vector<64x128xf32> to vector<128xf32>
    %121 = vector.shape_cast %120 : vector<128xf32> to vector<1x128xf32>
    %122 = arith.addf %92, %121 : vector<1x128xf32>
    %123 = arith.mulf %119, %119 : vector<64x128xf32>
    %cst_161 = arith.constant dense<0.000000e+00> : vector<128xf32>
    %124 = vector.multi_reduction <add>, %123, %cst_161 [0] : vector<64x128xf32> to vector<128xf32>
    %125 = vector.shape_cast %124 : vector<128xf32> to vector<1x128xf32>
    %126 = arith.addf %96, %125 : vector<1x128xf32>
    %c0_162 = arith.constant 0 : index
    %c0_163 = arith.constant 0 : index
    %127 = vector.load %arg8[%c0_162, %c0_163] : memref<1x128xf32, #tpu.memory_space<vmem>>, vector<1x128xf32>
    %128 = arith.addf %127, %122 : vector<1x128xf32>
    %c0_164 = arith.constant 0 : index
    %c0_165 = arith.constant 0 : index
    %129 = vector.load %arg8[%c0_164, %c0_165] : memref<1x128xf32, #tpu.memory_space<vmem>>, vector<1x128xf32>
    tpu.vector_store %arg8[%c0_164, %c0_165], %128 {strides = array<i32>} : memref<1x128xf32, #tpu.memory_space<vmem>>, vector<1x128xf32>,
    %c0_166 = arith.constant 0 : index
    %c0_167 = arith.constant 0 : index
    %130 = vector.load %arg9[%c0_166, %c0_167] : memref<1x128xf32, #tpu.memory_space<vmem>>, vector<1x128xf32>
    %131 = arith.addf %130, %126 : vector<1x128xf32>
    %c0_168 = arith.constant 0 : index
    %c0_169 = arith.constant 0 : index
    %132 = vector.load %arg9[%c0_168, %c0_169] : memref<1x128xf32, #tpu.memory_space<vmem>>, vector<1x128xf32>
    tpu.vector_store %arg9[%c0_168, %c0_169], %131 {strides = array<i32>} : memref<1x128xf32, #tpu.memory_space<vmem>>, vector<1x128xf32>,
    %c1_i32 = arith.constant 1 : i32
    %133 = arith.cmpi eq, %arg0, %c1_i32 : i32
    %c0_i32_170 = arith.constant 0 : i32
    %134 = arith.cmpi eq, %arg1, %c0_i32_170 : i32
    %135 = arith.andi %133, %134 : i1
    %136 = arith.extui %135 : i1 to i32
    %c0_i32_171 = arith.constant 0 : i32
    %137 = arith.cmpi ne, %136, %c0_i32_171 : i32
    scf.if %137 {
      %c0_172 = arith.constant 0 : index
      %c0_173 = arith.constant 0 : index
      %138 = vector.load %arg8[%c0_172, %c0_173] : memref<1x128xf32, #tpu.memory_space<vmem>>, vector<1x128xf32>
      %c0_174 = arith.constant 0 : index
      %c0_175 = arith.constant 0 : index
      %139 = vector.load %arg5[%c0_174, %c0_175] : memref<1x128xf32, #tpu.memory_space<vmem>>, vector<1x128xf32>
      tpu.vector_store %arg5[%c0_174, %c0_175], %138 {strides = array<i32>} : memref<1x128xf32, #tpu.memory_space<vmem>>, vector<1x128xf32>,
      %c0_176 = arith.constant 0 : index
      %c0_177 = arith.constant 0 : index
      %140 = vector.load %arg9[%c0_176, %c0_177] : memref<1x128xf32, #tpu.memory_space<vmem>>, vector<1x128xf32>
      %c0_178 = arith.constant 0 : index
      %c0_179 = arith.constant 0 : index
      %141 = vector.load %arg6[%c0_178, %c0_179] : memref<1x128xf32, #tpu.memory_space<vmem>>, vector<1x128xf32>
      tpu.vector_store %arg6[%c0_178, %c0_179], %140 {strides = array<i32>} : memref<1x128xf32, #tpu.memory_space<vmem>>, vector<1x128xf32>,
    } else {
    }
    return
  }
  func.func @transform_0(%arg0: i32, %arg1: i32) -> (i32, i32, i32, i32) {
    %c0_i32 = arith.constant 0 : i32
    %c0_i32_0 = arith.constant 0 : i32
    %c0_i32_1 = arith.constant 0 : i32
    return %arg0, %arg1, %c0_i32, %c0_i32_0 : i32, i32, i32, i32
  }
  func.func @transform_1(%arg0: i32, %arg1: i32) -> (i32, i32, i32, i32) {
    %c0_i32 = arith.constant 0 : i32
    %c0_i32_0 = arith.constant 0 : i32
    %c0_i32_1 = arith.constant 0 : i32
    return %arg0, %arg1, %c0_i32, %c0_i32_0 : i32, i32, i32, i32
  }
  func.func @transform_2(%arg0: i32, %arg1: i32) -> (i32, i32, i32, i32) {
    %c0_i32 = arith.constant 0 : i32
    %c0_i32_0 = arith.constant 0 : i32
    %c0_i32_1 = arith.constant 0 : i32
    %c0_i32_2 = arith.constant 0 : i32
    %c0_i32_3 = arith.constant 0 : i32
    return %c0_i32, %c0_i32_0, %c0_i32_1, %c0_i32_2 : i32, i32, i32, i32
  }
  func.func @transform_3(%arg0: i32, %arg1: i32) -> (i32, i32) {
    %c0_i32 = arith.constant 0 : i32
    %c0_i32_0 = arith.constant 0 : i32
    %c0_i32_1 = arith.constant 0 : i32
    return %c0_i32, %c0_i32_0 : i32, i32
  }
  func.func @transform_4(%arg0: i32, %arg1: i32) -> (i32, i32) {
    %c0_i32 = arith.constant 0 : i32
    %c0_i32_0 = arith.constant 0 : i32
    %c0_i32_1 = arith.constant 0 : i32
    return %c0_i32, %c0_i32_0 : i32, i32
  }
}

</mosaic_0001>

<bundles_post_ra>
// kernel: tpu_custom_call.1
= control target key start
LH: loop header
LB: loop body
LE: loop exit
PB: predicated region body
PF: predicated region fallthrough
CT: control target
= control target key end

     0   :  { %10 = vsyncpa [#allocation6], 0  ;;  %s2424_s0 = inlined_call_operand.vmem [shape: f32[2,1,72,16], index: 0, kind: input, shape index: {}]   ;;  %s2425_s1 = inlined_call_operand.vmem [shape: f32[2,1,72,16], index: 1, kind: input, shape index: {}]   ;;  %s2426_s2 = inlined_call_operand.vmem [shape: f32[4,4,16,128], index: 2, kind: input, shape index: {}]   ;;  %s2427_s3 = inlined_call_operand.hbm [shape: f32[1,128], index: 3, kind: output, shape index: {0}]   ;;  %s2428_s4 = inlined_call_operand.hbm [shape: f32[1,128], index: 4, kind: output, shape index: {1}]  }
   0x1   :  { %11 = vsyncpa [#allocation8], 0  ;;  %s1979_s15 = smov 0   ;;  %s1981_s16 = smov 0  }
   0x2   :  { %s1983_s17 = smov 0  }
   0x3 LB: > { %s1689_s18 = sadd.s32 4294967295, %s1949_s17   ;;  %s29_s19 = sadd.s32 1, %s1945_s16  ;;  %s1949_s17 = sphi %s1983_s17, %s17_s17   ;;  %s1945_s16 = sphi %s1981_s16, %s2431_s16   ;;  %s1941_s15 = sphi %s1979_s15, %s2430_s15  }
   0x4   : > { %p31_p0 = scmp.ge.s32.totalorder %s29_s19, 2  ;;  %p1692_p1 = scmp.ge.s32.totalorder %s1949_s17, 1 }
   0x5   : > { %p191_p2 = scmp.lt.s32.totalorder %s1949_s17, 3 }
   0x6   : > { %s2433_s19 = smov (%p31_p0, %s29_s19), 0 }
   0x7   : > { %p192_p3 = pnand %p1692_p1, %p191_p2 }
   0x8   : > { %p225_p4 = scmp.lt.s32.totalorder (!%p192_p3), %s1941_s15, 1  ;;  %p243_p5 = scmp.eq.s32.totalorder (!%p192_p3), %s1941_s15, 0 }
   0x9   : > { %195 = sbr.rel (%p192_p3) target bundleno = 384 (0x180), region = 32 }
   0xe   : > { %s226_s20 = scalar_select %p225_p4, %s1941_s15, 1  ;;  %v1951_v0 = vmov (%p243_p5), 0.0  }
   0xf   : > { %248 = sbr.rel (!%p243_p5) target bundleno = 20 (0x14), region = 36  ;;  %249 = vst [vmem:[#allocation3] sm:$0x1] (%p243_p5), %v1951_v0 }
  0x10   : > { %s1823_s21 = smul.u32 72, %s226_s20  ;;  %250 = vst [vmem:[#allocation4] sm:$0x1] (%p243_p5), %v1951_v0 }
  0x12   : > { %s2006_s24 = scalar_lea.vmem %s2424_s0, %s1823_s21  ;;  %s2011_s27 = scalar_lea.vmem %s2425_s1, %s1823_s21 }
  0x14 PF: > { %v260_v1 = vld [vmem:[%s2426_s2 + $0x8] sm:$0xff]  ;;  %v1715_v2 = vld [vmem:[%s2426_s2 + $0x18] sm:$0xff]  ;;  %v259_v4 = vld [vmem:[%s2426_s2] sm:$0xff]  ;;  %vm261_vm0 = vcmask 130048   ;;  %p1569_p6 = scmp.eq.s32.totalorder %s1941_s15, 1 }
  0x15   : > { %v1725_v3 = vld [vmem:[%s2426_s2 + $0x48] sm:$0xff]  ;;  %300 = vmatpush.msra.mxu0 %v260_v1  ;;  %484 = vmatpush.msra.mxu2 %v1715_v2  ;;  %v1714_v6 = vld [vmem:[%s2426_s2 + $0x10] sm:$0xff]  ;;  %v1724_v7 = vld [vmem:[%s2426_s2 + $0x40] sm:$0xff] }
  0x16   : > { %v1705_v5 = vld [vmem:[%s2426_s2 + $0x28] sm:$0xff]  ;;  %628 = vmatpush.msra.mxu3 %v1725_v3  ;;  %v251_v8 = vld [vmem:[%s2006_s24] sm:$0xff]  ;;  %v1765_v13 = vld [vmem:[%s2426_s2 + $0x98] sm:$0xff] }
  0x17   : > { %384 = vmatpush.msra.mxu1 %v1705_v5  ;;  %v2036_v9 = vld [vmem:[%s2006_s24 + $0x8] sm:$0xff]  ;;  %301 = vmatpush.msra.mxu0 %v259_v4  ;;  %v1704_v11 = vld [vmem:[%s2426_s2 + $0x20] sm:$0xff]  ;;  %v1745_v15 = vld [vmem:[%s2426_s2 + $0x58] sm:$0xff] }
  0x18   : > { %485 = vmatpush.msra.mxu2 %v1714_v6  ;;  %v1755_v10 = vld [vmem:[%s2426_s2 + $0xa8] sm:$0xff]  ;;  %629 = vmatpush.msra.mxu3 %v1724_v7  ;;  %v2046_v12 = vld [vmem:[%s2011_s27] sm:$0xff]  ;;  %v1764_v17 = vld [vmem:[%s2426_s2 + $0x90] sm:$0xff] }
  0x19   : > { %1696 = vmatmul.msk.f32.vlgmr.msra.gmra.mxu0 %vm261_vm0, %v251_v8  ;;  %1716 = vmatmul.msk.f32.vlgmr.msra.gmra.mxu2 %vm261_vm0, %v2036_v9  ;;  %v1735_v14 = vld [vmem:[%s2426_s2 + $0x68] sm:$0xff]  ;;  %v1754_v16 = vld [vmem:[%s2426_s2 + $0xa0] sm:$0xff]  ;;  %v1744_v19 = vld [vmem:[%s2426_s2 + $0x50] sm:$0xff] }
  0x1a   : > { %1726 = vmatmul.msk.f32.vlgmr.msra.gmra.mxu3 %vm261_vm0, %v251_v8  ;;  %956 = vmatpush.msrb.mxu2 %v1755_v10  ;;  %v1734_v18 = vld [vmem:[%s2426_s2 + $0x60] sm:$0xff]  ;;  %v2075_v20 = vld [vmem:[%s2006_s24 + $0x10] sm:$0xff]  ;;  %v2080_v21 = vld [vmem:[%s2011_s27 + $0x8] sm:$0xff] }
  0x1b   : > { %385 = vmatpush.msra.mxu1 %v1704_v11  ;;  %1040 = vmatpush.msrb.mxu3 %v1765_v13  ;;  %v2089_v22 = vld [vmem:[%s2006_s24 + $0x18] sm:$0xff]  ;;  %v2094_v23 = vld [vmem:[%s2011_s27 + $0x10] sm:$0xff]  ;;  %v2103_v24 = vld [vmem:[%s2006_s24 + $0x20] sm:$0xff] }
  0x1c   : > { %1706 = vmatmul.msk.f32.vlgmr.msra.gmra.mxu1 %vm261_vm0, %v2046_v12  ;;  %712 = vmatpush.msrb.mxu0 %v1735_v14  ;;  %v2108_v25 = vld [vmem:[%s2011_s27 + $0x18] sm:$0xff]  ;;  %v2117_v26 = vld [vmem:[%s2006_s24 + $0x28] sm:$0xff]  ;;  %v2122_v27 = vld [vmem:[%s2011_s27 + $0x20] sm:$0xff] }
  0x1d   : > { %812 = vmatpush.msrb.mxu1 %v1745_v15  ;;  %957 = vmatpush.msrb.mxu2 %v1754_v16  ;;  %v1795_v28 = vld [vmem:[%s2426_s2 + $0xd8] sm:$0xff]  ;;  %v1785_v31 = vld [vmem:[%s2426_s2 + $0xe8] sm:$0xff]  ;;  %v2143_v32 = vld [vmem:[%s2006_s24 + $0x30] sm:$0xff] }
  0x1e   : > { %1041 = vmatpush.msrb.mxu3 %v1764_v17  ;;  %713 = vmatpush.msrb.mxu0 %v1734_v18  ;;  %v1805_v29 = vld [vmem:[%s2426_s2 + $0xf8] sm:$0xff]  ;;  %v2148_v33 = vld [vmem:[%s2011_s27 + $0x28] sm:$0xff]  ;;  %v2162_v35 = vld [vmem:[%s2011_s27 + $0x30] sm:$0xff] }
  0x1f   : > { %813 = vmatpush.msrb.mxu1 %v1744_v19  ;;  %1368 = vmatpush.msra.mxu2 %v1795_v28  ;;  %v1775_v30 = vld [vmem:[%s2426_s2 + $0xb8] sm:$0xff]  ;;  %v2171_v36 = vld [vmem:[%s2006_s24 + $0x40] sm:$0xff]  ;;  %v1794_v38 = vld [vmem:[%s2426_s2 + $0xd0] sm:$0xff] }
  0x20   : > { %1468 = vmatpush.msra.mxu3 %v1805_v29  ;;  %1140 = vmatpush.msra.mxu0 %v1775_v30  ;;  %v2157_v34 = vld [vmem:[%s2006_s24 + $0x38] sm:$0xff]  ;;  %v1804_v39 = vld [vmem:[%s2426_s2 + $0xf0] sm:$0xff]  ;;  %v1784_v41 = vld [vmem:[%s2426_s2 + $0xe0] sm:$0xff] }
  0x21   : > { %1697 = vmatmul.msk.f32.gmra.mxu0 %vm261_vm0, %v2036_v9  ;;  %1717 = vmatmul.msk.f32.gmra.mxu2 %vm261_vm0, %v2075_v20  ;;  %v2176_v37 = vld [vmem:[%s2011_s27 + $0x38] sm:$0xff]  ;;  %v1774_v40 = vld [vmem:[%s2426_s2 + $0xb0] sm:$0xff] }
  0x22   : > { %1727 = vmatmul.msk.f32.gmra.mxu3 %vm261_vm0, %v2036_v9  ;;  %1284 = vmatpush.msra.mxu1 %v1785_v31 }
  0x23   : > { %1369 = vmatpush.msra.mxu2 %v1794_v38  ;;  %1469 = vmatpush.msra.mxu3 %v1804_v39 }
  0x24   : > { %1707 = vmatmul.msk.f32.gmra.mxu1 %vm261_vm0, %v2080_v21  ;;  %1141 = vmatpush.msra.mxu0 %v1774_v40 }
  0x25   : > { %1285 = vmatpush.msra.mxu1 %v1784_v41  ;;  %v1098_v41 = vld [vmem:[%s2011_s27 + $0x40] sm:$0xff] }
  0x29   : > { %1698 = vmatmul.msk.f32.gmra.mxu0 %vm261_vm0, %v2075_v20  ;;  %1718 = vmatmul.msk.f32.gmra.mxu2 %vm261_vm0, %v2089_v22 }
  0x2a   : > { %1728 = vmatmul.msk.f32.gmra.mxu3 %vm261_vm0, %v2075_v20 }
  0x2c   : > { %1708 = vmatmul.msk.f32.gmra.mxu1 %vm261_vm0, %v2094_v23 }
  0x31   : > { %1699 = vmatmul.msk.f32.gmra.mxu0 %vm261_vm0, %v2089_v22  ;;  %1719 = vmatmul.msk.f32.gmra.mxu2 %vm261_vm0, %v2103_v24 }
  0x32   : > { %1729 = vmatmul.msk.f32.gmra.mxu3 %vm261_vm0, %v2089_v22 }
  0x34   : > { %1709 = vmatmul.msk.f32.gmra.mxu1 %vm261_vm0, %v2108_v25 }
  0x39   : > { %1700 = vmatmul.msk.f32.gmra.mxu0 %vm261_vm0, %v2103_v24  ;;  %1720 = vmatmul.msk.f32.gmra.mxu2 %vm261_vm0, %v2117_v26 }
  0x3a   : > { %1730 = vmatmul.msk.f32.gmra.mxu3 %vm261_vm0, %v2103_v24 }
  0x3c   : > { %1710 = vmatmul.msk.f32.gmra.mxu1 %vm261_vm0, %v2122_v27 }
  0x41   : > { %1701 = vmatmul.msk.f32.gmra.mxu0 %vm261_vm0, %v2117_v26  ;;  %1721 = vmatmul.msk.f32.gmra.mxu2 %vm261_vm0, %v2143_v32 }
  0x42   : > { %1731 = vmatmul.msk.f32.gmra.mxu3 %vm261_vm0, %v2117_v26 }
  0x44   : > { %1711 = vmatmul.msk.f32.gmra.mxu1 %vm261_vm0, %v2148_v33 }
  0x49   : > { %1702 = vmatmul.msk.f32.gmra.mxu0 %vm261_vm0, %v2143_v32  ;;  %1722 = vmatmul.msk.f32.gmra.mxu2 %vm261_vm0, %v2157_v34 }
  0x4a   : > { %1732 = vmatmul.msk.f32.gmra.mxu3 %vm261_vm0, %v2143_v32 }
  0x4c   : > { %1712 = vmatmul.msk.f32.gmra.mxu1 %vm261_vm0, %v2162_v35 }
  0x51   : > { %1703 = vmatmul.msk.f32.gmra.mxu0 %vm261_vm0, %v2157_v34  ;;  %1723 = vmatmul.msk.f32.gmra.mxu2 %vm261_vm0, %v2171_v36 }
  0x52   : > { %1733 = vmatmul.msk.f32.gmra.mxu3 %vm261_vm0, %v2157_v34 }
  0x54   : > { %1713 = vmatmul.msk.f32.gmra.mxu1 %vm261_vm0, %v2176_v37 }
  0x59   : > { %1736 = vmatmul.msk.f32.vlgmr.msrb.gmra.mxu0 %vm261_vm0, %v2046_v12  ;;  %1756 = vmatmul.msk.f32.vlgmr.msrb.gmra.mxu2 %vm261_vm0, %v2046_v12 }
  0x5a   : > { %1766 = vmatmul.msk.f32.vlgmr.msrb.gmra.mxu3 %vm261_vm0, %v2036_v9 }
  0x5c   : > { %1746 = vmatmul.msk.f32.vlgmr.msrb.gmra.mxu1 %vm261_vm0, %v2036_v9 }
  0x61   : > { %1737 = vmatmul.msk.f32.gmra.mxu0 %vm261_vm0, %v2080_v21  ;;  %1757 = vmatmul.msk.f32.gmra.mxu2 %vm261_vm0, %v2080_v21 }
  0x62   : > { %1767 = vmatmul.msk.f32.gmra.mxu3 %vm261_vm0, %v2075_v20 }
  0x64   : > { %1747 = vmatmul.msk.f32.gmra.mxu1 %vm261_vm0, %v2075_v20 }
  0x69   : > { %1738 = vmatmul.msk.f32.gmra.mxu0 %vm261_vm0, %v2094_v23  ;;  %1758 = vmatmul.msk.f32.gmra.mxu2 %vm261_vm0, %v2094_v23 }
  0x6a   : > { %1768 = vmatmul.msk.f32.gmra.mxu3 %vm261_vm0, %v2089_v22 }
  0x6c   : > { %1748 = vmatmul.msk.f32.gmra.mxu1 %vm261_vm0, %v2089_v22 }
  0x71   : > { %1739 = vmatmul.msk.f32.gmra.mxu0 %vm261_vm0, %v2108_v25  ;;  %1759 = vmatmul.msk.f32.gmra.mxu2 %vm261_vm0, %v2108_v25 }
  0x72   : > { %1769 = vmatmul.msk.f32.gmra.mxu3 %vm261_vm0, %v2103_v24 }
  0x74   : > { %1749 = vmatmul.msk.f32.gmra.mxu1 %vm261_vm0, %v2103_v24 }
  0x79   : > { %1740 = vmatmul.msk.f32.gmra.mxu0 %vm261_vm0, %v2122_v27  ;;  %1760 = vmatmul.msk.f32.gmra.mxu2 %vm261_vm0, %v2122_v27 }
  0x7a   : > { %1770 = vmatmul.msk.f32.gmra.mxu3 %vm261_vm0, %v2117_v26 }
  0x7c   : > { %1750 = vmatmul.msk.f32.gmra.mxu1 %vm261_vm0, %v2117_v26 }
  0x81   : > { %1741 = vmatmul.msk.f32.gmra.mxu0 %vm261_vm0, %v2148_v33  ;;  %1761 = vmatmul.msk.f32.gmra.mxu2 %vm261_vm0, %v2148_v33 }
  0x82   : > { %1771 = vmatmul.msk.f32.gmra.mxu3 %vm261_vm0, %v2143_v32 }
  0x84   : > { %1751 = vmatmul.msk.f32.gmra.mxu1 %vm261_vm0, %v2143_v32 }
  0x89   : > { %1742 = vmatmul.msk.f32.gmra.mxu0 %vm261_vm0, %v2162_v35  ;;  %1762 = vmatmul.msk.f32.gmra.mxu2 %vm261_vm0, %v2162_v35 }
  0x8a   : > { %1772 = vmatmul.msk.f32.gmra.mxu3 %vm261_vm0, %v2157_v34 }
  0x8c   : > { %1752 = vmatmul.msk.f32.gmra.mxu1 %vm261_vm0, %v2157_v34 }
  0x91   : > { %1743 = vmatmul.msk.f32.gmra.mxu0 %vm261_vm0, %v2176_v37  ;;  %1763 = vmatmul.msk.f32.gmra.mxu2 %vm261_vm0, %v2176_v37 }
  0x92   : > { %1773 = vmatmul.msk.f32.gmra.mxu3 %vm261_vm0, %v2171_v36 }
  0x94   : > { %1753 = vmatmul.msk.f32.gmra.mxu1 %vm261_vm0, %v2171_v36 }
  0x96   : > { %v303_v42 = vpop.f32.mrf.mxu0 }
  0x99   : > { %v387_v43 = vpop.f32.mrf.mxu1  ;;  %1776 = vmatmul.msk.f32.vlgmr.msra.gmra.mxu0 %vm261_vm0, %v2080_v21  ;;  %1796 = vmatmul.msk.f32.vlgmr.msra.gmra.mxu2 %vm261_vm0, %v2036_v9 }
  0x9a   : > { %v419_v44 = vadd.f32 %v387_v43, %v303_v42  ;;  %1806 = vmatmul.msk.f32.vlgmr.msra.gmra.mxu3 %vm261_vm0, %v2080_v21 }
  0x9c   : > { %1786 = vmatmul.msk.f32.vlgmr.msra.gmra.mxu1 %vm261_vm0, %v2046_v12  ;;  %v487_v45 = vpop.f32.mrf.mxu2 }
  0x9d   : > { %v2268_v46 = vpop.f32.mrf.mxu3  ;;  %v519_v47 = vadd.f32 %v487_v45, %v419_v44 }
  0x9e   : > { %v306_v48 = vpop.f32.mrf.mxu0 }
  0x9f   : > { %v557_v55 = vmul.f32 %v519_v47, %v519_v47 }
  0xa1   : > { %v390_v49 = vpop.f32.mrf.mxu1  ;;  %1777 = vmatmul.msk.f32.gmra.mxu0 %vm261_vm0, %v2094_v23  ;;  %1797 = vmatmul.msk.f32.gmra.mxu2 %vm261_vm0, %v2075_v20 }
  0xa2   : > { %v420_v50 = vadd.f32 %v390_v49, %v306_v48  ;;  %1807 = vmatmul.msk.f32.gmra.mxu3 %vm261_vm0, %v2094_v23 }
  0xa4   : > { %1787 = vmatmul.msk.f32.gmra.mxu1 %vm261_vm0, %v2080_v21  ;;  %v490_v51 = vpop.f32.mrf.mxu2 }
  0xa5   : > { %v2278_v52 = vpop.f32.mrf.mxu3  ;;  %v520_v53 = vadd.f32 %v490_v51, %v420_v50 }
  0xa6   : > { %v309_v54 = vpop.f32.mrf.mxu0 }
  0xa7   : > { %v543_v56 = vadd.f32 %v520_v53, %v519_v47  ;;  %v558_v57 = vmul.f32 %v520_v53, %v520_v53 }
  0xa9   : > { %v393_v58 = vpop.f32.mrf.mxu1  ;;  %1778 = vmatmul.msk.f32.gmra.mxu0 %vm261_vm0, %v2108_v25  ;;  %v565_v59 = vadd.f32 %v558_v57, %v557_v55  ;;  %1798 = vmatmul.msk.f32.gmra.mxu2 %vm261_vm0, %v2089_v22 }
  0xaa   : > { %v421_v60 = vadd.f32 %v393_v58, %v309_v54  ;;  %1808 = vmatmul.msk.f32.gmra.mxu3 %vm261_vm0, %v2108_v25 }
  0xac   : > { %1788 = vmatmul.msk.f32.gmra.mxu1 %vm261_vm0, %v2094_v23  ;;  %v493_v61 = vpop.f32.mrf.mxu2 }
  0xad   : > { %v2288_v62 = vpop.f32.mrf.mxu3  ;;  %v521_v63 = vadd.f32 %v493_v61, %v421_v60 }
  0xae   : > { %v312_v0 = vpop.f32.mrf.mxu0 }
  0xaf   : > { %v544_v1 = vadd.f32 %v543_v56, %v521_v63  ;;  %v559_v2 = vmul.f32 %v521_v63, %v521_v63 }
  0xb1   : > { %v396_v3 = vpop.f32.mrf.mxu1  ;;  %1779 = vmatmul.msk.f32.gmra.mxu0 %vm261_vm0, %v2122_v27  ;;  %v566_v4 = vadd.f32 %v565_v59, %v559_v2  ;;  %1799 = vmatmul.msk.f32.gmra.mxu2 %vm261_vm0, %v2103_v24 }
  0xb2   : > { %v422_v5 = vadd.f32 %v396_v3, %v312_v0  ;;  %1809 = vmatmul.msk.f32.gmra.mxu3 %vm261_vm0, %v2122_v27 }
  0xb4   : > { %1789 = vmatmul.msk.f32.gmra.mxu1 %vm261_vm0, %v2108_v25  ;;  %v496_v6 = vpop.f32.mrf.mxu2 }
  0xb5   : > { %v2298_v7 = vpop.f32.mrf.mxu3  ;;  %v522_v8 = vadd.f32 %v496_v6, %v422_v5 }
  0xb6   : > { %v315_v9 = vpop.f32.mrf.mxu0 }
  0xb7   : > { %v545_v10 = vadd.f32 %v544_v1, %v522_v8  ;;  %v560_v11 = vmul.f32 %v522_v8, %v522_v8 }
  0xb9   : > { %v399_v12 = vpop.f32.mrf.mxu1  ;;  %1780 = vmatmul.msk.f32.gmra.mxu0 %vm261_vm0, %v2148_v33  ;;  %v567_v13 = vadd.f32 %v566_v4, %v560_v11  ;;  %1800 = vmatmul.msk.f32.gmra.mxu2 %vm261_vm0, %v2117_v26 }
  0xba   : > { %v423_v14 = vadd.f32 %v399_v12, %v315_v9  ;;  %1810 = vmatmul.msk.f32.gmra.mxu3 %vm261_vm0, %v2148_v33 }
  0xbc   : > { %1790 = vmatmul.msk.f32.gmra.mxu1 %vm261_vm0, %v2122_v27  ;;  %v499_v15 = vpop.f32.mrf.mxu2 }
  0xbd   : > { %v2308_v16 = vpop.f32.mrf.mxu3  ;;  %v523_v17 = vadd.f32 %v499_v15, %v423_v14 }
  0xbe   : > { %v318_v18 = vpop.f32.mrf.mxu0 }
  0xbf   : > { %v546_v19 = vadd.f32 %v545_v10, %v523_v17  ;;  %v561_v20 = vmul.f32 %v523_v17, %v523_v17 }
  0xc1   : > { %v402_v21 = vpop.f32.mrf.mxu1  ;;  %1781 = vmatmul.msk.f32.gmra.mxu0 %vm261_vm0, %v2162_v35  ;;  %v568_v22 = vadd.f32 %v567_v13, %v561_v20  ;;  %1801 = vmatmul.msk.f32.gmra.mxu2 %vm261_vm0, %v2143_v32 }
  0xc2   : > { %v424_v23 = vadd.f32 %v402_v21, %v318_v18  ;;  %1811 = vmatmul.msk.f32.gmra.mxu3 %vm261_vm0, %v2162_v35 }
  0xc4   : > { %1791 = vmatmul.msk.f32.gmra.mxu1 %vm261_vm0, %v2148_v33  ;;  %v502_v24 = vpop.f32.mrf.mxu2 }
  0xc5   : > { %v2318_v25 = vpop.f32.mrf.mxu3  ;;  %v524_v26 = vadd.f32 %v502_v24, %v424_v23 }
  0xc6   : > { %v321_v27 = vpop.f32.mrf.mxu0 }
  0xc7   : > { %v547_v28 = vadd.f32 %v546_v19, %v524_v26  ;;  %v562_v29 = vmul.f32 %v524_v26, %v524_v26 }
  0xc9   : > { %v405_v30 = vpop.f32.mrf.mxu1  ;;  %1782 = vmatmul.msk.f32.gmra.mxu0 %vm261_vm0, %v2176_v37  ;;  %v569_v31 = vadd.f32 %v568_v22, %v562_v29  ;;  %1802 = vmatmul.msk.f32.gmra.mxu2 %vm261_vm0, %v2157_v34 }
  0xca   : > { %v425_v32 = vadd.f32 %v405_v30, %v321_v27  ;;  %1812 = vmatmul.msk.f32.gmra.mxu3 %vm261_vm0, %v2176_v37 }
  0xcc   : > { %1792 = vmatmul.msk.f32.gmra.mxu1 %vm261_vm0, %v2162_v35  ;;  %v505_v33 = vpop.f32.mrf.mxu2 }
  0xcd   : > { %v2328_v38 = vpop.f32.mrf.mxu3  ;;  %v525_v39 = vadd.f32 %v505_v33, %v425_v32 }
  0xce   : > { %v324_v40 = vpop.f32.mrf.mxu0 }
  0xcf   : > { %v548_v42 = vadd.f32 %v547_v28, %v525_v39  ;;  %v563_v43 = vmul.f32 %v525_v39, %v525_v39 }
  0xd1   : > { %v408_v44 = vpop.f32.mrf.mxu1  ;;  %1783 = vmatmul.msk.f32.gmra.mxu0 %vm261_vm0, %v1098_v41  ;;  %v570_v45 = vadd.f32 %v569_v31, %v563_v43  ;;  %1803 = vmatmul.msk.f32.gmra.mxu2 %vm261_vm0, %v2171_v36 }
  0xd2   : > { %v426_v47 = vadd.f32 %v408_v44, %v324_v40  ;;  %1813 = vmatmul.msk.f32.gmra.mxu3 %vm261_vm0, %v1098_v41 }
  0xd4   : > { %1793 = vmatmul.msk.f32.gmra.mxu1 %vm261_vm0, %v2176_v37  ;;  %v508_v34 = vpop.f32.mrf.mxu2 }
  0xd5   : > { %v2337_v35 = vpop.f32.mrf.mxu3  ;;  %v526_v48 = vadd.f32 %v508_v34, %v426_v47 }
  0xd6   : > { %v715_v49 = vpop.f32.mrf.mxu0 }
  0xd7   : > { %v747_v50 = vadd.f32 %v715_v49, %v2268_v46  ;;  %v2340_v51 = vadd.f32 %v548_v42, %v526_v48  ;;  %v564_v53 = vmul.f32 %v526_v48, %v526_v48 }
  0xd9   : > { %v815_v54 = vpop.f32.mrf.mxu1  ;;  %v2342_v55 = vadd.f32 %v570_v45, %v564_v53 }
  0xda   : > { %v847_v56 = vadd.f32 %v815_v54, %v747_v50 }
  0xdc   : > { %v959_v36 = vpop.f32.mrf.mxu2  ;;  %v885_v63 = vmul.f32 %v847_v56, %v847_v56 }
  0xdd   : > { %v1043_v57 = vpop.f32.mrf.mxu3 }
  0xde   : > { %v2344_v58 = vadd.f32 %v1043_v57, %v959_v36  ;;  %v718_v59 = vpop.f32.mrf.mxu0 }
  0xdf   : > { %v748_v37 = vadd.f32 %v718_v59, %v2278_v52 }
  0xe1   : > { %v818_v60 = vpop.f32.mrf.mxu1 }
  0xe2   : > { %v848_v61 = vadd.f32 %v818_v60, %v748_v37  ;;  %v572_v37 = vrot.slane %v2342_v55, 4 }
  0xe4   : > { %v871_v0 = vadd.f32 %v848_v61, %v847_v56  ;;  %v886_v1 = vmul.f32 %v848_v61, %v848_v61  ;;  %v962_v46 = vpop.f32.mrf.mxu2  ;;  %v550_v56 = vrot.slane %v2340_v51, 4 }
  0xe5   : > { %v1046_v2 = vpop.f32.mrf.mxu3 }
  0xe6   : > { %v893_v3 = vadd.f32 %v886_v1, %v885_v63  ;;  %v2347_v4 = vadd.f32 %v1046_v2, %v962_v46  ;;  %v721_v5 = vpop.f32.mrf.mxu0  ;;  %v551_v1 = vadd.f32 %v550_v56, %v2340_v51 }
  0xe7   : > { %v749_v6 = vadd.f32 %v721_v5, %v2288_v62 }
  0xe9   : > { %v821_v8 = vpop.f32.mrf.mxu1 }
  0xea   : > { %v849_v9 = vadd.f32 %v821_v8, %v749_v6 }
  0xec   : > { %v872_v10 = vadd.f32 %v871_v0, %v849_v9  ;;  %v887_v11 = vmul.f32 %v849_v9, %v849_v9  ;;  %v965_v12 = vpop.f32.mrf.mxu2 }
  0xed   : > { %v1049_v52 = vpop.f32.mrf.mxu3 }
  0xee   : > { %v894_v13 = vadd.f32 %v893_v3, %v887_v11  ;;  %v2350_v14 = vadd.f32 %v1049_v52, %v965_v12  ;;  %v724_v15 = vpop.f32.mrf.mxu0  ;;  %v552_v3 = vrot.slane %v551_v1, 2 }
  0xef   : > { %v750_v17 = vadd.f32 %v724_v15, %v2298_v7 }
  0xf1   : > { %v824_v18 = vpop.f32.mrf.mxu1 }
  0xf2   : > { %v850_v19 = vadd.f32 %v824_v18, %v750_v17 }
  0xf4   : > { %v873_v20 = vadd.f32 %v872_v10, %v850_v19  ;;  %v888_v21 = vmul.f32 %v850_v19, %v850_v19  ;;  %v968_v22 = vpop.f32.mrf.mxu2 }
  0xf5   : > { %v1052_v23 = vpop.f32.mrf.mxu3 }
  0xf6   : > { %v895_v62 = vadd.f32 %v894_v13, %v888_v21  ;;  %v2354_v24 = vadd.f32 %v1052_v23, %v968_v22  ;;  %v727_v26 = vpop.f32.mrf.mxu0  ;;  %v553_v13 = vadd.f32 %v552_v3, %v551_v1 }
  0xf7   : > { %v751_v27 = vadd.f32 %v727_v26, %v2308_v16 }
  0xf9   : > { %v827_v28 = vpop.f32.mrf.mxu1 }
  0xfa   : > { %v851_v29 = vadd.f32 %v827_v28, %v751_v27 }
  0xfc   : > { %v874_v30 = vadd.f32 %v873_v20, %v851_v29  ;;  %v889_v31 = vmul.f32 %v851_v29, %v851_v29  ;;  %v971_v32 = vpop.f32.mrf.mxu2 }
  0xfd   : > { %v1055_v33 = vpop.f32.mrf.mxu3 }
  0xfe   : > { %v896_v39 = vadd.f32 %v895_v62, %v889_v31  ;;  %v2357_v7 = vadd.f32 %v1055_v33, %v971_v32  ;;  %v730_v40 = vpop.f32.mrf.mxu0 }
  0xff   : > { %v752_v41 = vadd.f32 %v730_v40, %v2318_v25 }
 0x101   : > { %v830_v42 = vpop.f32.mrf.mxu1 }
 0x102   : > { %v852_v43 = vadd.f32 %v830_v42, %v752_v41 }
 0x104   : > { %v875_v44 = vadd.f32 %v874_v30, %v852_v43  ;;  %v890_v45 = vmul.f32 %v852_v43, %v852_v43  ;;  %v974_v47 = vpop.f32.mrf.mxu2 }
 0x105   : > { %v1058_v34 = vpop.f32.mrf.mxu3 }
 0x106   : > { %v897_v48 = vadd.f32 %v896_v39, %v890_v45  ;;  %v2360_v16 = vadd.f32 %v1058_v34, %v974_v47  ;;  %v733_v49 = vpop.f32.mrf.mxu0 }
 0x107   : > { %v753_v50 = vadd.f32 %v733_v49, %v2328_v38  ;;  %v573_v38 = vadd.f32 %v572_v37, %v2342_v55  ;;  %v554_v55 = vrot.slane %v553_v13, 1 }
 0x109   : > { %v833_v53 = vpop.f32.mrf.mxu1  ;;  %v574_v10 = vrot.slane %v573_v38, 2  ;;  %v555_v31 = vadd.f32 %v554_v55, %v553_v13 }
 0x10a   : > { %v853_v54 = vadd.f32 %v833_v53, %v753_v50 }
 0x10b   : > { %v575_v51 = vadd.f32 %v574_v10, %v573_v38 }
 0x10c   : > { %v876_v36 = vadd.f32 %v875_v44, %v853_v54  ;;  %v891_v57 = vmul.f32 %v853_v54, %v853_v54  ;;  %v977_v59 = vpop.f32.mrf.mxu2 }
 0x10d   : > { %v1061_v25 = vpop.f32.mrf.mxu3  ;;  %v576_v26 = vrot.slane %v575_v51, 1 }
 0x10e   : > { %v898_v60 = vadd.f32 %v897_v48, %v891_v57  ;;  %v2365_v61 = vadd.f32 %v1061_v25, %v977_v59  ;;  %v736_v63 = vpop.f32.mrf.mxu0 }
 0x10f   : > { %v754_v0 = vadd.f32 %v736_v63, %v2337_v35  ;;  %v577_v43 = vadd.f32 %v576_v26, %v575_v51 }
 0x111   : > { %v836_v46 = vpop.f32.mrf.mxu1 }
 0x112   : > { %v854_v2 = vadd.f32 %v836_v46, %v754_v0 }
 0x114   : > { %v877_v5 = vadd.f32 %v876_v36, %v854_v2  ;;  %v892_v6 = vmul.f32 %v854_v2, %v854_v2  ;;  %v2370_v8 = vpop.f32.mrf.mxu2 }
 0x115   : > { %v2372_v9 = vpop.f32.mrf.mxu3 }
 0x116   : > { %v878_v11 = vrot.slane %v877_v5, 4  ;;  %v899_v12 = vadd.f32 %v898_v60, %v892_v6  ;;  %v1143_v52 = vpop.f32.mrf.mxu0 }
 0x117   : > { %v1175_v22 = vadd.f32 %v1143_v52, %v2344_v58 }
 0x118   : > { %v879_v15 = vadd.f32 %v878_v11, %v877_v5  ;;  %v900_v35 = vrot.slane %v899_v12, 4 }
 0x119   : > { %v1287_v17 = vpop.f32.mrf.mxu1  ;;  %v1213_v39 = vmul.f32 %v1175_v22, %v1175_v22 }
 0x11a   : > { %v880_v18 = vrot.slane %v879_v15, 2  ;;  %v901_v19 = vadd.f32 %v900_v35, %v899_v12 }
 0x11c   : > { %v881_v20 = vadd.f32 %v880_v18, %v879_v15  ;;  %v902_v21 = vrot.slane %v901_v19, 2  ;;  %v1371_v23 = vpop.f32.mrf.mxu2 }
 0x11d   : > { %v1471_v62 = vpop.f32.mrf.mxu3  ;;  %v1403_v18 = vadd.f32 %v1371_v23, %v1287_v17  ;;  %v1082_v17 = vadd.f32 %v2372_v9, %v2370_v8 }
 0x11e   : > { %v882_v27 = vrot.slane %v881_v20, 1  ;;  %v903_v28 = vadd.f32 %v902_v21, %v901_v19  ;;  %v1146_v29 = vpop.f32.mrf.mxu0 }
 0x11f   : > { %v1176_v30 = vadd.f32 %v1146_v29, %v2347_v4 }
 0x120   : > { %v883_v32 = vadd.f32 %v882_v27, %v881_v20  ;;  %v904_v33 = vrot.slane %v903_v28, 1  ;;  %v1503_v27 = vadd.f32 %v1471_v62, %v1403_v18 }
 0x121   : > { %v1199_v40 = vadd.f32 %v1176_v30, %v1175_v22  ;;  %v1214_v41 = vmul.f32 %v1176_v30, %v1176_v30  ;;  %v1290_v42 = vpop.f32.mrf.mxu1 }
 0x122   : > { %v2376_v44 = vadd.f32 %v883_v32, %v555_v31  ;;  %v905_v45 = vadd.f32 %v904_v33, %v903_v28  ;;  %v1541_v23 = vmul.f32 %v1503_v27, %v1503_v27 }
 0x123   : > { %v1221_v58 = vadd.f32 %v1214_v41, %v1213_v39 }
 0x124   : > { %v2378_v47 = vadd.f32 %v905_v45, %v577_v43  ;;  %v1374_v34 = vpop.f32.mrf.mxu2 }
 0x125   : > { %v1474_v48 = vpop.f32.mrf.mxu3  ;;  %v1404_v51 = vadd.f32 %v1374_v34, %v1290_v42 }
 0x126   : > { %v1149_v49 = vpop.f32.mrf.mxu0 }
 0x127   : > { %v1177_v50 = vadd.f32 %v1149_v49, %v2350_v14  ;;  %v1504_v22 = vadd.f32 %v1474_v48, %v1404_v51 }
 0x129   : > { %v1200_v4 = vadd.f32 %v1199_v40, %v1177_v50  ;;  %v1215_v53 = vmul.f32 %v1177_v50, %v1177_v50  ;;  %v1293_v54 = vpop.f32.mrf.mxu1  ;;  %v1542_v33 = vmul.f32 %v1504_v22, %v1504_v22  ;;  %v1527_v43 = vadd.f32 %v1504_v22, %v1503_v27 }
 0x12b   : > { %v1222_v56 = vadd.f32 %v1221_v58, %v1215_v53  ;;  %v1549_v48 = vadd.f32 %v1542_v33, %v1541_v23  ;;  %v1563_v23 = vld [vmem:[#allocation3] sm:$0x1] }
 0x12c   : > { %v1377_v36 = vpop.f32.mrf.mxu2 }
 0x12d   : > { %v1477_v57 = vpop.f32.mrf.mxu3  ;;  %v1405_v20 = vadd.f32 %v1377_v36, %v1293_v54 }
 0x12e   : > { %v1152_v59 = vpop.f32.mrf.mxu0 }
 0x12f   : > { %v1178_v25 = vadd.f32 %v1152_v59, %v2354_v24  ;;  %v1505_v31 = vadd.f32 %v1477_v57, %v1405_v20 }
 0x131   : > { %v1201_v37 = vadd.f32 %v1200_v4, %v1178_v25  ;;  %v1216_v60 = vmul.f32 %v1178_v25, %v1178_v25  ;;  %v1296_v63 = vpop.f32.mrf.mxu1  ;;  %v1528_v49 = vadd.f32 %v1527_v43, %v1505_v31  ;;  %v1566_v43 = vld [vmem:[#allocation4] sm:$0x1] }
 0x133   : > { %v1223_v0 = vadd.f32 %v1222_v56, %v1216_v60 }
 0x134   : > { %v1380_v1 = vpop.f32.mrf.mxu2 }
 0x135   : > { %v1480_v46 = vpop.f32.mrf.mxu3  ;;  %v1406_v26 = vadd.f32 %v1380_v1, %v1296_v63 }
 0x136   : > { %v1155_v38 = vpop.f32.mrf.mxu0 }
 0x137   : > { %v1179_v2 = vadd.f32 %v1155_v38, %v2357_v7  ;;  %v1506_v39 = vadd.f32 %v1480_v46, %v1406_v26 }
 0x139   : > { %v1202_v3 = vadd.f32 %v1201_v37, %v1179_v2  ;;  %v1217_v14 = vmul.f32 %v1179_v2, %v1179_v2  ;;  %v1299_v5 = vpop.f32.mrf.mxu1  ;;  %v1544_v50 = vmul.f32 %v1506_v39, %v1506_v39  ;;  %v1529_v36 = vadd.f32 %v1528_v49, %v1506_v39 }
 0x13b   : > { %v1224_v6 = vadd.f32 %v1223_v0, %v1217_v14 }
 0x13c   : > { %v1383_v10 = vpop.f32.mrf.mxu2 }
 0x13d   : > { %v1483_v11 = vpop.f32.mrf.mxu3 }
 0x13e   : > { %v1158_v12 = vpop.f32.mrf.mxu0 }
 0x13f   : > { %v1180_v52 = vadd.f32 %v1158_v12, %v2360_v16  ;;  %v1407_v16 = vadd.f32 %v1383_v10, %v1299_v5 }
 0x141   : > { %v1203_v13 = vadd.f32 %v1202_v3, %v1180_v52  ;;  %v1218_v24 = vmul.f32 %v1180_v52, %v1180_v52  ;;  %v1302_v15 = vpop.f32.mrf.mxu1  ;;  %v1507_v45 = vadd.f32 %v1483_v11, %v1407_v16 }
 0x143   : > { %v1225_v35 = vadd.f32 %v1224_v6, %v1218_v24  ;;  %v1545_v57 = vmul.f32 %v1507_v45, %v1507_v45  ;;  %v1530_v60 = vadd.f32 %v1529_v36, %v1507_v45 }
 0x144   : > { %v1386_v19 = vpop.f32.mrf.mxu2 }
 0x145   : > { %v1486_v55 = vpop.f32.mrf.mxu3  ;;  %v1408_v40 = vadd.f32 %v1386_v19, %v1302_v15 }
 0x146   : > { %v1161_v21 = vpop.f32.mrf.mxu0 }
 0x147   : > { %v1181_v7 = vadd.f32 %v1161_v21, %v2365_v61  ;;  %v1543_v61 = vmul.f32 %v1505_v31, %v1505_v31  ;;  %v1508_v4 = vadd.f32 %v1486_v55, %v1408_v40 }
 0x149   : > { %v1204_v28 = vadd.f32 %v1203_v13, %v1181_v7  ;;  %v1219_v29 = vmul.f32 %v1181_v7, %v1181_v7  ;;  %v1305_v30 = vpop.f32.mrf.mxu1  ;;  %v1550_v56 = vadd.f32 %v1549_v48, %v1543_v61  ;;  %v1546_v63 = vmul.f32 %v1508_v4, %v1508_v4 }
 0x14a   : > { %v1531_v3 = vadd.f32 %v1530_v60, %v1508_v4 }
 0x14b   : > { %v1226_v32 = vadd.f32 %v1225_v35, %v1219_v29  ;;  %v1551_v37 = vadd.f32 %v1550_v56, %v1544_v50 }
 0x14c   : > { %v1389_v41 = vpop.f32.mrf.mxu2 }
 0x14d   : > { %v1489_v42 = vpop.f32.mrf.mxu3  ;;  %v1409_v58 = vadd.f32 %v1389_v41, %v1305_v30  ;;  %v1552_v2 = vadd.f32 %v1551_v37, %v1545_v57 }
 0x14e   : > { %v1164_v62 = vpop.f32.mrf.mxu0 }
 0x14f   : > { %v1182_v34 = vadd.f32 %v1164_v62, %v1082_v17  ;;  %v1509_v59 = vadd.f32 %v1489_v42, %v1409_v58  ;;  %v1553_v11 = vadd.f32 %v1552_v2, %v1546_v63 }
 0x151   : > { %v1205_v53 = vadd.f32 %v1204_v28, %v1182_v34  ;;  %v1220_v54 = vmul.f32 %v1182_v34, %v1182_v34  ;;  %v1308_v25 = vpop.f32.mrf.mxu1  ;;  %v1547_v14 = vmul.f32 %v1509_v59, %v1509_v59  ;;  %v1532_v12 = vadd.f32 %v1531_v3, %v1509_v59 }
 0x153   : > { %v1206_v8 = vrot.slane %v1205_v53, 4  ;;  %v1227_v9 = vadd.f32 %v1226_v32, %v1220_v54  ;;  %v1554_v15 = vadd.f32 %v1553_v11, %v1547_v14 }
 0x154   : > { %v1392_v46 = vpop.f32.mrf.mxu2 }
 0x155   : > { %v1207_v0 = vadd.f32 %v1206_v8, %v1205_v53  ;;  %v1228_v1 = vrot.slane %v1227_v9, 4  ;;  %v1492_v38 = vpop.f32.mrf.mxu3  ;;  %v1410_v5 = vadd.f32 %v1392_v46, %v1308_v25 }
 0x157   : > { %v1208_v6 = vrot.slane %v1207_v0, 2  ;;  %v1229_v10 = vadd.f32 %v1228_v1, %v1227_v9  ;;  %v1510_v52 = vadd.f32 %v1492_v38, %v1410_v5 }
 0x159   : > { %v1209_v13 = vadd.f32 %v1208_v6, %v1207_v0  ;;  %v1230_v24 = vrot.slane %v1229_v10, 2  ;;  %v1533_v35 = vadd.f32 %v1532_v12, %v1510_v52  ;;  %v1548_v51 = vmul.f32 %v1510_v52, %v1510_v52 }
 0x15b   : > { %v1210_v18 = vrot.slane %v1209_v13, 1  ;;  %v1231_v19 = vadd.f32 %v1230_v24, %v1229_v10  ;;  %v1534_v55 = vrot.slane %v1533_v35, 4  ;;  %v1555_v20 = vadd.f32 %v1554_v15, %v1548_v51 }
 0x15d   : > { %v1211_v21 = vadd.f32 %v1210_v18, %v1209_v13  ;;  %v1232_v7 = vrot.slane %v1231_v19, 1  ;;  %v1535_v22 = vadd.f32 %v1534_v55, %v1533_v35  ;;  %v1556_v26 = vrot.slane %v1555_v20, 4 }
 0x15f   : > { %v1212_v27 = vadd.f32 %v1211_v21, %v2376_v44  ;;  %v1233_v28 = vadd.f32 %v1232_v7, %v1231_v19  ;;  %v1536_v29 = vrot.slane %v1535_v22, 2  ;;  %v1557_v30 = vadd.f32 %v1556_v26, %v1555_v20 }
 0x161   : > { %v1234_v31 = vadd.f32 %v1233_v28, %v2378_v47  ;;  %v1537_v16 = vadd.f32 %v1536_v29, %v1535_v22  ;;  %v1558_v32 = vrot.slane %v1557_v30, 2 }
 0x163   : > { %v1538_v33 = vrot.slane %v1537_v16, 1  ;;  %v1559_v39 = vadd.f32 %v1558_v32, %v1557_v30 }
 0x165   : > { %v1539_v40 = vadd.f32 %v1538_v33, %v1537_v16  ;;  %v1560_v17 = vrot.slane %v1559_v39, 1 }
 0x167   : > { %v1540_v41 = vadd.f32 %v1539_v40, %v1212_v27  ;;  %v1561_v42 = vadd.f32 %v1560_v17, %v1559_v39 }
 0x169   : > { %v1562_v61 = vadd.f32 %v1561_v42, %v1234_v31  ;;  %v1564_v45 = vadd.f32 %v1563_v23, %v1540_v41  ;;  %1573 = sbr.rel (!%p1569_p6) target bundleno = 374 (0x176), region = 40 }
 0x16b   : > { %1565 = vst [vmem:[#allocation3] sm:$0x1] %v1564_v45  ;;  %v1567_v58 = vadd.f32 %v1566_v43, %v1562_v61 }
 0x16d   : > { %1568 = vst [vmem:[#allocation4] sm:$0x1] %v1567_v58 }
 0x172   : > { %v1574_v44 = vld [vmem:[#allocation3] sm:$0x1] }
 0x173   : > { %1575 = vst [vmem:[#allocation5] sm:$0x1] %v1574_v44 }
 0x174   : > { %v1576_v47 = vld [vmem:[#allocation4] sm:$0x1] }
 0x175   : > { %1577 = vst [vmem:[#allocation7] sm:$0x1] %v1576_v47 }
 0x176 PF: > { %p2393_p7 = scmp.eq.s32.totalorder %s1689_s18, 1  ;;  %s1586_s13 = sshll.u32 %s2427_s3, 4  ;;  %s1587_s13 = int_to_ptr.hbm [resolvable:$true] %s1586_s13 }
 0x177   : > { %s1952_s15 = smov [#allocation5]   ;;  %s1953_s20 = smov [#allocation7]  }
 0x178   : > { %s1584_s14 = sshll.u32 %s1952_s15, 4  ;;  %s1596_s21 = sshll.u32 %s1953_s20, 4  ;;  %s1585_s14 = int_to_ptr.vmem [resolvable:$true] %s1584_s14  ;;  %s1597_s21 = int_to_ptr.vmem [resolvable:$true] %s1596_s21 }
 0x179   : > { %1825 = dma.vmem_to_hbm [thread:$0]  (%p2393_p7), %s1585_s14, 16, %s1587_s13, [#allocation6]  }
 0x17a   : > { %s1598_s23 = sshll.u32 %s2428_s4, 4  ;;  %s1599_s23 = int_to_ptr.hbm [resolvable:$true] %s1598_s23 }
 0x17b   : > { %1827 = dma.vmem_to_hbm [thread:$0]  (%p2393_p7), %s1597_s21, 16, %s1599_s23, [#allocation8]  }
 0x17c   : > { %1932 = dma.done.wait (%p2393_p7), [#allocation6], 16  }
 0x17d   : > { %1934 = vsyncadd (%p2393_p7), [#allocation6], 4294967280 }
 0x17e   : > { %1936 = dma.done.wait (%p2393_p7), [#allocation8], 16  }
 0x17f   : > { %1938 = vsyncadd (%p2393_p7), [#allocation8], 4294967280 }
 0x180 PF: > { %s17_s17 = sadd.s32 1, %s1949_s17   ;;  %s2430_s15 = smov %s1945_s16 }
 0x181   : > { %p14_p8 = scmp.ge.s32.totalorder %s17_s17, 4   ;;  %s2431_s16 = smov %s2433_s19 }
 0x183   :  { %16 = sbr.rel (!%p14_p8) target bundleno = 3 (0x3), region = 89 }
 0x188   :  { %1617 = vsyncpa [#allocation6], 1 }
 0x189   :  { %1619 = vsyncpa [#allocation6 + $0x1], 1 }
 0x18a   :  { %1620 = vsyncpa [#allocation8], 1 }

</bundles_post_ra>
